<compile_context>
chip_gen: v5e
topology: v5e:2x2
jax: 0.10.0
libtpu: 0.0.40
codegen_flags: <defaults>
</compile_context>

<pallas_src>
import jax
import jax.numpy as jnp
from jax import lax
from jax.experimental import pallas as pl
from jax.experimental.pallas import tpu as pltpu

HIDDEN = 128  # fixed by the module (linear1 out_features)


def _round_up(x, m):
    return pl.cdiv(x, m) * m


def _ngram_kernel(ctx_ref, emb_ref, w1_ref, b1_ref, w2_ref, b2_ref, out_ref):
    # ctx: (bb, C) int32 | emb: (Vp, E) bf16 | w1: (C*E, H) bf16 | b1: (1, H) f32
    # w2: (H, Vp) bf16   | b2: (1, Vp) f32 (padded lanes pre-set to -1e30)
    # out: (bb, Vp) f32 (or bf16)
    bb, ctx_size = ctx_ref.shape
    vocab_p, emb_dim = emb_ref.shape

    ids = ctx_ref[...]                                        # (bb, C) int32
    col = lax.broadcasted_iota(jnp.int32, (bb, vocab_p), 1)   # lane index

    # Fused embedding lookup + linear1: per context position a one-hot
    # (bb, Vp) @ (Vp, E) MXU matmul selects the bf16 embedding rows exactly
    # (single 1 per row, f32 accumulation), then accumulates through the
    # matching static (E, H) slice of W1.  C is a tiny static Python int.
    h = b1_ref[...].astype(jnp.float32)                       # (1, H), broadcasts
    for c in range(ctx_size):
        onehot = (col == ids[:, c:c + 1]).astype(emb_ref.dtype)
        e_c = jnp.dot(onehot, emb_ref[...],
                      preferred_element_type=jnp.float32)     # (bb, E), exact
        h = h + jnp.dot(e_c.astype(w1_ref.dtype),
                        w1_ref[c * emb_dim:(c + 1) * emb_dim, :],
                        preferred_element_type=jnp.float32)
    h = jnp.maximum(h, 0.0)                                   # ReLU

    logits = jnp.dot(h.astype(w2_ref.dtype), w2_ref[...],
                     preferred_element_type=jnp.float32) + b2_ref[...]

    # Numerically stable log_softmax; padded lanes already sit at -1e30 via b2,
    # so no extra masking is needed here.
    m = jnp.max(logits, axis=-1, keepdims=True)
    shifted = logits - m
    lse = jnp.log(jnp.sum(jnp.exp(shifted), axis=-1, keepdims=True))
    out_ref[...] = (shifted - lse).astype(out_ref.dtype)


def ngram_forward_batch(contexts, emb_table, w1_t, b1, w2_t, b2, *,
                        block_b=None, out_dtype=jnp.float32):
    """contexts: (B, context_size) int token ids -> (B, vocab) log-probs."""
    B, ctx_size = contexts.shape
    vocab, emb_dim = emb_table.shape
    d_in = ctx_size * emb_dim
    hidden = w1_t.shape[1]
    assert w2_t.shape == (hidden, vocab)

    # Lane-dense padded vocab: 256-multiples feed the 256-wide v6e/v7x MXU;
    # 128 is exactly right for small vocab and for v5e's 128-wide MXU.
    lane = 256 if vocab > 128 else 128
    vocab_p = _round_up(vocab, lane)

    # Batch tile: large (up to 256) to fill the MXU and amortize the ~0.35us
    # per-grid-step overhead, a multiple of 16 for bf16 sublane packing, and
    # >= 2 grid steps when the batch allows it (v7x has 2 TensorCores).
    if block_b is None:
        block_b = min(256, _round_up(B, 16))
        if _round_up(B, block_b) // block_b < 2 and block_b >= 32:
            block_b = _round_up(block_b // 2, 16)
    b_pad = _round_up(B, block_b)

    ctx = contexts.astype(jnp.int32)
    if b_pad != B:
        ctx = jnp.pad(ctx, ((0, b_pad - B), (0, 0)))          # pad rows use id 0

    # bf16 weights halve HBM->VMEM traffic; zero-pad to the lane-dense vocab.
    emb_p = jnp.zeros((vocab_p, emb_dim), jnp.bfloat16).at[:vocab].set(
        emb_table.astype(jnp.bfloat16))
    w1_bf = w1_t.astype(jnp.bfloat16)
    b1_2d = b1.reshape(1, hidden).astype(jnp.float32)
    w2_p = jnp.zeros((hidden, vocab_p), jnp.bfloat16).at[:, :vocab].set(
        w2_t.astype(jnp.bfloat16))
    # Padding mask baked into b2: padded w2 columns are zero, so -1e30 bias
    # lanes give -1e30 padded logits with no in-kernel iota/compare/where.
    b2_p = jnp.full((1, vocab_p), -1e30, jnp.float32).at[:, :vocab].set(
        b2.reshape(1, vocab).astype(jnp.float32))

    grid = (b_pad // block_b,)
    out_itemsize = jnp.dtype(out_dtype).itemsize

    # Explicit VMEM budget from the actual (double-buffered) tile sums, capped
    # at 64 MiB so the same config stays safe on v7x's smaller VMEM.
    tile_bytes = (2 * (block_b * ctx_size * 4 + block_b * vocab_p * out_itemsize)
                  + 2 * (vocab_p * emb_dim * 2 + d_in * hidden * 2 + hidden * 4
                         + hidden * vocab_p * 2 + vocab_p * 4))
    vmem_limit = int(min(64 * 1024 * 1024, max(4 * tile_bytes, 32 * 1024 * 1024)))

    flops = 2 * b_pad * (ctx_size * vocab_p * emb_dim + d_in * hidden
                         + hidden * vocab_p)
    transcendentals = b_pad * (vocab_p + 1)
    bytes_accessed = (b_pad * ctx_size * 4 + vocab_p * emb_dim * 2
                      + d_in * hidden * 2 + hidden * 4 + hidden * vocab_p * 2
                      + vocab_p * 4 + b_pad * vocab_p * out_itemsize)

    out = pl.pallas_call(
        _ngram_kernel,
        out_shape=jax.ShapeDtypeStruct((b_pad, vocab_p), out_dtype),
        grid_spec=pltpu.PrefetchScalarGridSpec(
            num_scalar_prefetch=0,
            grid=grid,
            in_specs=[
                pl.BlockSpec((block_b, ctx_size), lambda i: (i, 0)),   # token ids
                pl.BlockSpec((vocab_p, emb_dim), lambda i: (0, 0)),    # emb resident
                pl.BlockSpec((d_in, hidden), lambda i: (0, 0)),        # w1 resident
                pl.BlockSpec((1, hidden), lambda i: (0, 0)),           # b1 resident
                pl.BlockSpec((hidden, vocab_p), lambda i: (0, 0)),     # w2 resident
                pl.BlockSpec((1, vocab_p), lambda i: (0, 0)),          # b2 resident
            ],
            out_specs=pl.BlockSpec((block_b, vocab_p), lambda i: (i, 0)),
        ),
        compiler_params=pltpu.CompilerParams(
            dimension_semantics=("parallel",),
            vmem_limit_bytes=vmem_limit),
        cost_estimate=pl.CostEstimate(
            flops=int(flops),
            transcendentals=int(transcendentals),
            bytes_accessed=int(bytes_accessed)),
    )(ctx, emb_p, w1_bf, b1_2d, w2_p, b2_p)

    return out[:B, :vocab]


def ngram_forward(inputs, emb_table, w1_t, b1, w2_t, b2):
    """Single-context forward matching the PyTorch module.

    inputs: (context_size,) int32 token ids.
    Returns (log_probs (1, vocab), embedding_table) like the nn.Module forward.
    """
    log_probs = ngram_forward_batch(inputs[None, :], emb_table, w1_t, b1, w2_t, b2)
    return log_probs, emb_table


if __name__ == "__main__":
    # Small, module-consistent shapes.
    VOCAB_SIZE = 64
    EMBEDDING_DIM = 16
    CONTEXT_SIZE = 2
    BATCH = 16  # batch of contexts processed in one call

    key = jax.random.PRNGKey(0)
    k_emb, k_w1, k_b1, k_w2, k_b2, k_in = jax.random.split(key, 6)

    # Deterministic synthetic parameters (shapes match nn.Module __init__).
    emb_table = jax.random.normal(k_emb, (VOCAB_SIZE, EMBEDDING_DIM), jnp.float32)
    # PyTorch Linear weight is (out, in); store transposed (in, out) for x @ W.
    w1_t = 0.1 * jax.random.normal(
        k_w1, (CONTEXT_SIZE * EMBEDDING_DIM, HIDDEN), jnp.float32)
    b1 = 0.1 * jax.random.normal(k_b1, (HIDDEN,), jnp.float32)
    w2_t = 0.1 * jax.random.normal(k_w2, (HIDDEN, VOCAB_SIZE), jnp.float32)
    b2 = 0.1 * jax.random.normal(k_b2, (VOCAB_SIZE,), jnp.float32)

    # Example input: BATCH contexts of CONTEXT_SIZE token ids each.
    contexts = jax.random.randint(
        k_in, (BATCH, CONTEXT_SIZE), 0, VOCAB_SIZE, jnp.int32)

    # Batched path.
    log_probs_b = jax.block_until_ready(
        ngram_forward_batch(contexts, emb_table, w1_t, b1, w2_t, b2))

    # Single-context path, same signature/semantics as the PyTorch forward.
    log_probs_1, emb_out = ngram_forward(contexts[0], emb_table, w1_t, b1, w2_t, b2)
    log_probs_1 = jax.block_until_ready(log_probs_1)

    # Pure-JAX reference with the same bf16 storage as the kernel.
    emb_bf = emb_table.astype(jnp.bfloat16).astype(jnp.float32)
    w1_r = w1_t.astype(jnp.bfloat16).astype(jnp.float32)
    w2_r = w2_t.astype(jnp.bfloat16).astype(jnp.float32)
    x_r = jnp.take(emb_bf, contexts.reshape(-1), axis=0).reshape(BATCH, -1)
    h_r = jnp.maximum(x_r @ w1_r + b1, 0.0)
    h_r = h_r.astype(jnp.bfloat16).astype(jnp.float32)
    logits_r = h_r @ w2_r + b2
    ref = jax.nn.log_softmax(logits_r, axis=1)

    assert log_probs_b.shape == (BATCH, VOCAB_SIZE)
    assert log_probs_1.shape == (1, VOCAB_SIZE)
    assert jnp.allclose(log_probs_b, ref, atol=2e-2), "batched mismatch vs reference"
    assert jnp.allclose(log_probs_1, ref[0:1], atol=2e-2), "single-context mismatch"
    assert emb_out is emb_table

    print("KERNEL_OK")
</pallas_src>

<mosaic_0001>
module attributes {stable_mosaic.version = 11 : i64} {
  func.func @_ngram_kernel(%arg0: i32, %arg1: memref<16x2xi32, #tpu.memory_space<vmem>>, %arg2: memref<128x16xbf16, #tpu.memory_space<vmem>>, %arg3: memref<32x128xbf16, #tpu.memory_space<vmem>>, %arg4: memref<1x128xf32, #tpu.memory_space<vmem>>, %arg5: memref<128x128xbf16, #tpu.memory_space<vmem>>, %arg6: memref<1x128xf32, #tpu.memory_space<vmem>>, %arg7: memref<16x128xf32, #tpu.memory_space<vmem>>) attributes {dimension_semantics = [#tpu.dimension_semantics<parallel>], iteration_bounds = array<i64: 1>, scalar_prefetch = 0 : i64, scratch_operands = 0 : i64, tpu.core_type = #tpu.core_type<tc>, window_params = [{transform_indices = @transform_0, window_bounds = array<i64: 16, 2>}, {pipeline_mode = #tpu.pipeline_mode<synchronous>, transform_indices = @transform_1, window_bounds = array<i64: 128, 16>}, {pipeline_mode = #tpu.pipeline_mode<synchronous>, transform_indices = @transform_2, window_bounds = array<i64: 32, 128>}, {pipeline_mode = #tpu.pipeline_mode<synchronous>, transform_indices = @transform_3, window_bounds = array<i64: 1, 128>}, {pipeline_mode = #tpu.pipeline_mode<synchronous>, transform_indices = @transform_4, window_bounds = array<i64: 128, 128>}, {pipeline_mode = #tpu.pipeline_mode<synchronous>, transform_indices = @transform_5, window_bounds = array<i64: 1, 128>}, {transform_indices = @transform_6, window_bounds = array<i64: 16, 128>}]} {
    %c0 = arith.constant 0 : index
    %c0_0 = arith.constant 0 : index
    %0 = vector.load %arg1[%c0, %c0_0] : memref<16x2xi32, #tpu.memory_space<vmem>>, vector<16x2xi32>
    %1 = tpu.iota {dimensions = array<i32: 1>} : vector<16x128xi32>
    %c0_1 = arith.constant 0 : index
    %c0_2 = arith.constant 0 : index
    %2 = vector.load %arg4[%c0_1, %c0_2] : memref<1x128xf32, #tpu.memory_space<vmem>>, vector<1x128xf32>
    %3 = vector.extract_strided_slice %0 {offsets = [0, 0], sizes = [16, 1], strides = [1, 1]} : vector<16x2xi32> to vector<16x1xi32>
    %4 = vector.broadcast %3 : vector<16x1xi32> to vector<16x128xi32>
    %5 = arith.cmpi eq, %1, %4 : vector<16x128xi32>
    %6 = arith.extui %5 : vector<16x128xi1> to vector<16x128xi32>
    %7 = arith.sitofp %6 : vector<16x128xi32> to vector<16x128xf32>
    %8 = arith.truncf %7 : vector<16x128xf32> to vector<16x128xbf16>
    %c0_3 = arith.constant 0 : index
    %c0_4 = arith.constant 0 : index
    %9 = vector.load %arg2[%c0_3, %c0_4] : memref<128x16xbf16, #tpu.memory_space<vmem>>, vector<128x16xbf16>
    %cst = arith.constant dense<0.000000e+00> : vector<16x16xf32>
    %10 = tpu.matmul %8, %9, %cst {dimension_numbers = #tpu.dot_dimension_numbers<[1], [0], [0], [1], [0, 0, 1, 1], [], []>} : vector<16x128xbf16>, vector<128x16xbf16>, vector<16x16xf32> -> vector<16x16xf32>
    %11 = arith.truncf %10 : vector<16x16xf32> to vector<16x16xbf16>
    %c0_5 = arith.constant 0 : index
    %c0_6 = arith.constant 0 : index
    %12 = vector.load %arg3[%c0_5, %c0_6] : memref<32x128xbf16, #tpu.memory_space<vmem>>, vector<16x128xbf16>
    %cst_7 = arith.constant dense<0.000000e+00> : vector<16x128xf32>
    %13 = tpu.matmul %11, %12, %cst_7 {dimension_numbers = #tpu.dot_dimension_numbers<[1], [0], [0], [1], [0, 0, 1, 1], [], []>} : vector<16x16xbf16>, vector<16x128xbf16>, vector<16x128xf32> -> vector<16x128xf32>
    %14 = vector.broadcast %2 : vector<1x128xf32> to vector<16x128xf32>
    %15 = arith.addf %14, %13 : vector<16x128xf32>
    %16 = vector.extract_strided_slice %0 {offsets = [0, 1], sizes = [16, 1], strides = [1, 1]} : vector<16x2xi32> to vector<16x1xi32>
    %17 = vector.broadcast %16 : vector<16x1xi32> to vector<16x128xi32>
    %18 = arith.cmpi eq, %1, %17 : vector<16x128xi32>
    %19 = arith.extui %18 : vector<16x128xi1> to vector<16x128xi32>
    %20 = arith.sitofp %19 : vector<16x128xi32> to vector<16x128xf32>
    %21 = arith.truncf %20 : vector<16x128xf32> to vector<16x128xbf16>
    %c0_8 = arith.constant 0 : index
    %c0_9 = arith.constant 0 : index
    %22 = vector.load %arg2[%c0_8, %c0_9] : memref<128x16xbf16, #tpu.memory_space<vmem>>, vector<128x16xbf16>
    %cst_10 = arith.constant dense<0.000000e+00> : vector<16x16xf32>
    %23 = tpu.matmul %21, %22, %cst_10 {dimension_numbers = #tpu.dot_dimension_numbers<[1], [0], [0], [1], [0, 0, 1, 1], [], []>} : vector<16x128xbf16>, vector<128x16xbf16>, vector<16x16xf32> -> vector<16x16xf32>
    %24 = arith.truncf %23 : vector<16x16xf32> to vector<16x16xbf16>
    %c16 = arith.constant 16 : index
    %c0_11 = arith.constant 0 : index
    %25 = vector.load %arg3[%c16, %c0_11] : memref<32x128xbf16, #tpu.memory_space<vmem>>, vector<16x128xbf16>
    %cst_12 = arith.constant dense<0.000000e+00> : vector<16x128xf32>
    %26 = tpu.matmul %24, %25, %cst_12 {dimension_numbers = #tpu.dot_dimension_numbers<[1], [0], [0], [1], [0, 0, 1, 1], [], []>} : vector<16x16xbf16>, vector<16x128xbf16>, vector<16x128xf32> -> vector<16x128xf32>
    %27 = arith.addf %15, %26 : vector<16x128xf32>
    %cst_13 = arith.constant 0.000000e+00 : f32
    %28 = vector.broadcast %cst_13 : f32 to vector<16x128xf32>
    %29 = arith.maximumf %27, %28 : vector<16x128xf32>
    %30 = arith.truncf %29 : vector<16x128xf32> to vector<16x128xbf16>
    %c0_14 = arith.constant 0 : index
    %c0_15 = arith.constant 0 : index
    %31 = vector.load %arg5[%c0_14, %c0_15] : memref<128x128xbf16, #tpu.memory_space<vmem>>, vector<128x128xbf16>
    %cst_16 = arith.constant dense<0.000000e+00> : vector<16x128xf32>
    %32 = tpu.matmul %30, %31, %cst_16 {dimension_numbers = #tpu.dot_dimension_numbers<[1], [0], [0], [1], [0, 0, 1, 1], [], []>} : vector<16x128xbf16>, vector<128x128xbf16>, vector<16x128xf32> -> vector<16x128xf32>
    %c0_17 = arith.constant 0 : index
    %c0_18 = arith.constant 0 : index
    %33 = vector.load %arg6[%c0_17, %c0_18] : memref<1x128xf32, #tpu.memory_space<vmem>>, vector<1x128xf32>
    %34 = vector.broadcast %33 : vector<1x128xf32> to vector<16x128xf32>
    %35 = arith.addf %32, %34 : vector<16x128xf32>
    %cst_19 = arith.constant dense<0xFF800000> : vector<16xf32>
    %36 = vector.multi_reduction <maximumf>, %35, %cst_19 [1] : vector<16x128xf32> to vector<16xf32>
    %37 = vector.shape_cast %36 : vector<16xf32> to vector<16x1xf32>
    %38 = vector.broadcast %37 : vector<16x1xf32> to vector<16x128xf32>
    %39 = arith.subf %35, %38 : vector<16x128xf32>
    %40 = math.exp %39 : vector<16x128xf32>
    %cst_20 = arith.constant dense<0.000000e+00> : vector<16xf32>
    %41 = vector.multi_reduction <add>, %40, %cst_20 [1] : vector<16x128xf32> to vector<16xf32>
    %42 = vector.shape_cast %41 : vector<16xf32> to vector<16x1xf32>
    %43 = math.log %42 : vector<16x1xf32>
    %44 = vector.broadcast %43 : vector<16x1xf32> to vector<16x128xf32>
    %45 = arith.subf %39, %44 : vector<16x128xf32>
    %c0_21 = arith.constant 0 : index
    %c0_22 = arith.constant 0 : index
    %46 = vector.load %arg7[%c0_21, %c0_22] : memref<16x128xf32, #tpu.memory_space<vmem>>, vector<16x128xf32>
    tpu.vector_store %arg7[%c0_21, %c0_22], %45 {strides = array<i32>} : memref<16x128xf32, #tpu.memory_space<vmem>>, vector<16x128xf32>,
    return
  }
  func.func @transform_0(%arg0: i32) -> (i32, i32) {
    %c0_i32 = arith.constant 0 : i32
    %c0_i32_0 = arith.constant 0 : i32
    return %arg0, %c0_i32 : i32, i32
  }
  func.func @transform_1(%arg0: i32) -> (i32, i32) {
    %c0_i32 = arith.constant 0 : i32
    %c0_i32_0 = arith.constant 0 : i32
    %c0_i32_1 = arith.constant 0 : i32
    return %c0_i32, %c0_i32_0 : i32, i32
  }
  func.func @transform_2(%arg0: i32) -> (i32, i32) {
    %c0_i32 = arith.constant 0 : i32
    %c0_i32_0 = arith.constant 0 : i32
    %c0_i32_1 = arith.constant 0 : i32
    return %c0_i32, %c0_i32_0 : i32, i32
  }
  func.func @transform_3(%arg0: i32) -> (i32, i32) {
    %c0_i32 = arith.constant 0 : i32
    %c0_i32_0 = arith.constant 0 : i32
    %c0_i32_1 = arith.constant 0 : i32
    return %c0_i32, %c0_i32_0 : i32, i32
  }
  func.func @transform_4(%arg0: i32) -> (i32, i32) {
    %c0_i32 = arith.constant 0 : i32
    %c0_i32_0 = arith.constant 0 : i32
    %c0_i32_1 = arith.constant 0 : i32
    return %c0_i32, %c0_i32_0 : i32, i32
  }
  func.func @transform_5(%arg0: i32) -> (i32, i32) {
    %c0_i32 = arith.constant 0 : i32
    %c0_i32_0 = arith.constant 0 : i32
    %c0_i32_1 = arith.constant 0 : i32
    return %c0_i32, %c0_i32_0 : i32, i32
  }
  func.func @transform_6(%arg0: i32) -> (i32, i32) {
    %c0_i32 = arith.constant 0 : i32
    %c0_i32_0 = arith.constant 0 : i32
    return %arg0, %c0_i32 : i32, i32
  }
}

</mosaic_0001>

<bundles_post_ra>
// kernel: tpu_custom_call.1
= control target key start
LH: loop header
LB: loop body
LE: loop exit
PB: predicated region body
PF: predicated region fallthrough
CT: control target
= control target key end

     0   :  { %v478_v2 = vmov 1   ;;  %v479_v3 = vmov 0   ;;  %s588_s0 = inlined_call_operand.vmem [shape: s32[16,2], index: 0, kind: input, shape index: {}]   ;;  %s589_s1 = inlined_call_operand.vmem [shape: bf16[128,16], index: 1, kind: input, shape index: {}]   ;;  %s590_s2 = inlined_call_operand.vmem [shape: bf16[32,128], index: 2, kind: input, shape index: {}]   ;;  %s591_s3 = inlined_call_operand.vmem [shape: f32[1,128], index: 3, kind: input, shape index: {}]   ;;  %s592_s4 = inlined_call_operand.vmem [shape: bf16[128,128], index: 4, kind: input, shape index: {}]   ;;  %s593_s5 = inlined_call_operand.vmem [shape: f32[1,128], index: 5, kind: input, shape index: {}]   ;;  %s594_s6 = inlined_call_operand.hbm [shape: f32[16,128], index: 6, kind: output, shape index: {}]  }
   0x1   :  { %v25_v0 = vld [vmem:[%s588_s0] sm:$0xff]  ;;  %v422_v1 = vld [vmem:[%s589_s1 + $0x38] sm:$0xff]  ;;  %440 = vset.pattern.permute.xlu1 %v478_v2  ;;  %439 = vset.pattern.permute.xlu0 %v479_v3  ;;  %v421_v4 = vld [vmem:[%s589_s1 + $0x30] sm:$0xff] }
   0x2   :  { %154 = vperm.xlu1 %440, %v25_v0   ;;  %31 = vperm.xlu0 %439, %v25_v0  }
   0x3   :  { %107 = vmatpush.bf16.msra.mxu0 %v422_v1  ;;  %166 = vmatpush.bf16.msra.mxu2 %v422_v1 }
   0x4   :  { %11 = vsyncpa [#allocation3], 0  ;;  %v26_v5 = vld [vmem:[%s588_s0 + $0x8] sm:$0xff]  ;;  %v419_v7 = vld [vmem:[%s589_s1 + $0x20] sm:$0xff]  ;;  %v27_v14 = vlaneseq  ;;  %v480_v18 = vmov 1.0|1.0  }
   0x5   :  { %v420_v6 = vld [vmem:[%s589_s1 + $0x28] sm:$0xff]  ;;  %v418_v8 = vld [vmem:[%s589_s1 + $0x18] sm:$0xff]  ;;  %v417_v9 = vld [vmem:[%s589_s1 + $0x10] sm:$0xff]  ;;  %vm130_vm6 = vcmask 130048   ;;  %s321_s14 = sshll.u32 %s594_s6, 4  ;;  %s482_s15 = smov 128   ;;  %s322_s14 = int_to_ptr.hbm [resolvable:$true] %s321_s14 }
   0x6   :  { %v416_v10 = vld [vmem:[%s589_s1 + $0x8] sm:$0xff]  ;;  %v415_v11 = vld [vmem:[%s589_s1] sm:$0xff]  ;;  %v28_v15 = vand.u32 127, %v27_v14  ;;  %v432_v27 = vld [vmem:[%s592_s4 + $0x38] sm:$0xff]  ;;  %s483_s16 = smov 8  }
   0x7   :  { %108 = vmatpush.bf16.msra.mxu0 %v421_v4  ;;  %167 = vmatpush.bf16.msra.mxu2 %v421_v4  ;;  %v423_v19 = vld [vmem:[%s590_s2] sm:$0xff]  ;;  %v424_v20 = vld [vmem:[%s590_s2 + $0x8] sm:$0xff]  ;;  %v431_v28 = vld [vmem:[%s592_s4 + $0x30] sm:$0xff] }
   0x8   :  { %141 = vmatpush.bf16.msra.mxu3 %v423_v19  ;;  %279 = vmatpush.bf16.msra.mxu1 %v432_v27  ;;  %v430_v29 = vld [vmem:[%s592_s4 + $0x28] sm:$0xff]  ;;  %v429_v30 = vld [vmem:[%s592_s4 + $0x20] sm:$0xff]  ;;  %v428_v31 = vld [vmem:[%s592_s4 + $0x18] sm:$0xff] }
   0x9   :  { %v427_v32 = vld [vmem:[%s592_s4 + $0x10] sm:$0xff]  ;;  %v426_v33 = vld [vmem:[%s592_s4 + $0x8] sm:$0xff]  ;;  %v425_v34 = vld [vmem:[%s592_s4] sm:$0xff] }
   0xa   :  { %157 = vperm.xlu1 %440, %v26_v5   ;;  %34 = vperm.xlu0 %439, %v26_v5   ;;  %v442_v38 = vld [vmem:[%s591_s3] ss:$0 sm:$0xff]  ;;  %s481_s3 = smov [#allocation2]  }
   0xb   :  { %109 = vmatpush.bf16.msra.mxu0 %v420_v6  ;;  %168 = vmatpush.bf16.msra.mxu2 %v420_v6  ;;  %v443_v47 = vld [vmem:[%s593_s5] ss:$0 sm:$0xff]  ;;  %s319_s4 = sshll.u32 %s481_s3, 4  ;;  %s320_s4 = int_to_ptr.vmem [resolvable:$true] %s319_s4 }
   0xc   :  { %199 = vmatpush.bf16.msrb.mxu3 %v424_v20  ;;  %280 = vmatpush.bf16.msra.mxu1 %v431_v28 }
   0xf   :  { %110 = vmatpush.bf16.msra.mxu0 %v419_v7  ;;  %169 = vmatpush.bf16.msra.mxu2 %v419_v7 }
  0x10   :  { %281 = vmatpush.bf16.msra.mxu1 %v430_v29 }
  0x12   :  { %441 = vset.pattern.permute.xlu0 %v478_v2 }
  0x13   :  { %111 = vmatpush.bf16.msra.mxu0 %v418_v8  ;;  %170 = vmatpush.bf16.msra.mxu2 %v418_v8 }
  0x14   :  { %282 = vmatpush.bf16.msra.mxu1 %v429_v30 }
  0x17   :  { %112 = vmatpush.bf16.msra.mxu0 %v417_v9  ;;  %171 = vmatpush.bf16.msra.mxu2 %v417_v9 }
  0x18   :  { %283 = vmatpush.bf16.msra.mxu1 %v428_v31 }
  0x1b   :  { %113 = vmatpush.bf16.msra.mxu0 %v416_v10  ;;  %172 = vmatpush.bf16.msra.mxu2 %v416_v10 }
  0x1c   :  { %284 = vmatpush.bf16.msra.mxu1 %v427_v32 }
  0x1f   :  { %114 = vmatpush.bf16.msra.mxu0 %v415_v11  ;;  %173 = vmatpush.bf16.msra.mxu2 %v415_v11 }
  0x20   :  { %285 = vmatpush.bf16.msra.mxu1 %v426_v33 }
  0x24   :  { %286 = vmatpush.bf16.msra.mxu1 %v425_v34 }
  0x74   :  { %v155_v12 = vpop.permute.xlu1 %154  ;;  %v32_v13 = vpop.permute.xlu0 %31 }
  0x75   :  { %vm159_vm0 = vcmp.eq.s32.totalorder %v28_v15, %v155_v12  ;;  %vm36_vm3 = vcmp.eq.s32.totalorder %v28_v15, %v32_v13 }
  0x7c   :  { %v158_v16 = vpop.permute.xlu1 %157  ;;  %v35_v17 = vpop.permute.xlu0 %34 }
  0x7d   :  { %vm160_vm1 = vcmp.eq.s32.totalorder %v28_v15, %v158_v16  ;;  %vm37_vm2 = vcmp.eq.s32.totalorder %v28_v15, %v35_v17 }
  0x7e   :  { %vm376_vm4 = vmpackc.low %vm160_vm1, %vm159_vm0 }
  0x7f   :  { %vm367_vm5 = vmpackc.low %vm37_vm2, %vm36_vm3  ;;  %377 = vmatmul.msk.bf16.vlgmr.msra.gmra.mxu2 %vm376_vm4, %v480_v18 }
  0x80   :  { %368 = vmatmul.msk.bf16.vlgmr.msra.gmra.mxu0 %vm367_vm5, %v480_v18 }
  0xfd   :  { %v116_v21 = vpop.f32.mrf.mxu0 }
 0x102   :  { %v175_v24 = vpop.f32.mrf.mxu2 }
 0x105   :  { %v118_v22 = vpop.f32.mrf.mxu0 }
 0x106   :  { %v121_v23 = vpack.c.bf16 %v118_v22, %v116_v21 }
 0x108   :  { %373 = vmatmul.msk.bf16.vlgmr.msra.gmra.mxu3 %vm130_vm6, %v121_v23 }
 0x10a   :  { %v177_v25 = vpop.f32.mrf.mxu2 }
 0x10b   :  { %v180_v26 = vpack.c.bf16 %v177_v25, %v175_v24 }
 0x118   :  { %382 = vmatmul.msk.bf16.vlgmr.msrb.gmra.mxu3 %vm130_vm6, %v180_v26 }
 0x18b   :  { %v143_v35 = vpop.f32.mrf.mxu3 }
 0x18c   :  { %v151_v39 = vadd.f32 %v442_v38, %v143_v35 }
 0x193   :  { %v145_v36 = vpop.f32.mrf.mxu3 }
 0x194   :  { %v152_v40 = vadd.f32 %v442_v38, %v145_v36 }
 0x19b   :  { %v201_v37 = vpop.f32.mrf.mxu3 }
 0x19c   :  { %v206_v41 = vadd.f32 %v201_v37, %v151_v39 }
 0x19e   :  { %v208_v44 = vmax.f32 %v206_v41, 0.0 }
 0x1a3   :  { %v203_v42 = vpop.f32.mrf.mxu3 }
 0x1a4   :  { %v207_v43 = vadd.f32 %v203_v42, %v152_v40 }
 0x1a6   :  { %v209_v45 = vmax.f32 %v207_v43, 0.0 }
 0x1a8   :  { %v210_v46 = vpack.c.bf16 %v209_v45, %v208_v44 }
 0x1aa   :  { %287 = vmatmul.bf16.vlgmr.msra.gmra.mxu1 %v210_v46 }
 0x227   :  { %v288_v48 = vpop.f32.mrf.mxu1 }
 0x228   :  { %v289_v49 = vadd.f32 %v443_v47, %v288_v48 }
 0x22a   :  { %293 = vmax.xlane.f32.xlu2 %v289_v49 }
 0x22f   :  { %v290_v50 = vpop.f32.mrf.mxu1 }
 0x230   :  { %v291_v51 = vadd.f32 %v443_v47, %v290_v50 }
 0x232   :  { %295 = vmax.xlane.f32.xlu2 %v291_v51 }
 0x29d   :  { %v294_v52 = vpop.xlane.xlu2 %293 }
 0x29e   :  { %v297_v53 = vsub.f32 %v289_v49, %v294_v52 }
 0x2a0   :  { %v299_v54 = vmul.f32 1.442695, %v297_v53 }
 0x2a2   :  { %444 = vpow2.f32 %v299_v54 }
 0x2a5   :  { %v296_v55 = vpop.xlane.xlu2 %295 }
 0x2a6   :  { %v298_v56 = vsub.f32 %v291_v51, %v296_v55 }
 0x2a8   :  { %v445_v57 = vpop.eup %444  ;;  %v301_v58 = vmul.f32 1.442695, %v298_v56 }
 0x2a9   :  { %303 = vadd.xlane.f32.xlu0 %v445_v57 }
 0x2aa   :  { %446 = vpow2.f32 %v301_v58 }
 0x2b0   :  { %v447_v59 = vpop.eup %446 }
 0x2b1   :  { %305 = vadd.xlane.f32.xlu1 %v447_v59 }
 0x31c   :  { %v304_v60 = vpop.xlane.xlu0 %303 }
 0x31d   :  { %448 = vlog2.f32 %v304_v60 }
 0x323   :  { %v449_v61 = vpop.eup %448 }
 0x324   :  { %v308_v62 = vmul.f32 0.6931472, %v449_v61  ;;  %v306_v63 = vpop.xlane.xlu1 %305 }
 0x325   :  { %450 = vlog2.f32 %v306_v63 }
 0x326   :  { %v311_v0 = vsub.f32 %v297_v53, %v308_v62 }
 0x328   :  { %313 = vst [vmem:[#allocation2] sm:$0xff] %v311_v0 }
 0x32b   :  { %v451_v1 = vpop.eup %450 }
 0x32c   :  { %v310_v2 = vmul.f32 0.6931472, %v451_v1 }
 0x32e   :  { %v312_v3 = vsub.f32 %v298_v56, %v310_v2 }
 0x330   :  { %314 = vst [vmem:[#allocation2 + $0x8] sm:$0xff] %v312_v3 }
 0x331   :  { %327 = dma.vmem_to_hbm [thread:$0]  %s320_s4, 256, %s322_s14, [#allocation3], %s482_s15, %s482_s15, %s483_s16  }
 0x332   :  { %476 = dma.done.wait [#allocation3], 256  }
 0x333   :  { %477 = vsyncadd [#allocation3], 4294967040 }
 0x334   :  { %332 = vsyncpa [#allocation3], 1 }

</bundles_post_ra>
